<compile_context>
chip_gen: v5e
topology: v5e:2x2
jax: 0.10.0
libtpu: 0.0.40
codegen_flags: <defaults>
</compile_context>

<pallas_src>
import math

import jax
import jax.numpy as jnp
from jax.experimental import pallas as pl
from jax.experimental.pallas import tpu as pltpu


def _fixed_mean_kernel(mean_row_ref, o_ref):
    # Pure sublane-broadcast: replicate one lane-dense (1, W) mean row across
    # all rows of the (TILE_R, W) output block.  VPU-only fill; no MXU/XLU.
    o_ref[...] = jnp.broadcast_to(mean_row_ref[...], o_ref.shape)


def _choose_group(N, D, target_lanes=1024):
    """Pick the row-fold factor G.

    The kernel stores rows of width W = G*D, which is always a multiple of 128
    lanes (unmasked stores).  Widen toward ~target_lanes lanes to cut grid
    steps / store descriptors, preferring a G that divides N exactly so no
    padding (and no final slice copy) is needed.
    """
    g_min = 128 // math.gcd(D, 128)          # 1 when D % 128 == 0
    w_min = g_min * D                        # already a multiple of 128
    f_max = max(1, target_lanes // w_min)
    for f in range(f_max, 0, -1):
        if N % (g_min * f) == 0:
            return g_min * f                 # exact fit, no padding
    return g_min * f_max                     # widest; pad rows, slice after


def fixed_mean_forward(x, mean):
    """FixedMeanModule.forward.

    Args:
      x:    (N, B) base output matrix (only its leading dim is used), or 1-D.
      mean: (D,) fixed mean vector.

    Returns:
      mean (D,) if x is 1-D, else (N, D) = N copies of mean.
    """
    mean = jnp.asarray(mean)
    if x.ndim == 1:
        # 1-D branch of the module: just return the mean vector (no kernel).
        return mean

    N = int(x.shape[0])
    D = int(mean.shape[-1])
    itemsize = jnp.dtype(mean.dtype).itemsize

    # --- lane-dense row grouping ---------------------------------------------
    G = _choose_group(N, D)
    W = G * D                                # lane width of one stored row
    N_pad = -(-N // G) * G                   # padded logical rows (>= N)
    R = N_pad // G                           # grouped rows the kernel stores

    # Grid-invariant parameter row: the mean tiled G times, shape (1, W).
    mean_row = jnp.tile(mean.reshape(1, D), (1, G))

    # --- tiling over the grouped-row axis ------------------------------------
    # Target ~4 MiB per output block (multiple of 8 rows); double-buffered
    # (~8 MiB) this stays well under the explicit 32 MiB VMEM limit below.
    target_block_bytes = 4 << 20
    tile_r = max(8, (target_block_bytes // (W * itemsize)) // 8 * 8)
    if tile_r >= R:
        tile_r = R                           # single block == full array dim
        num_blocks = 1
    else:
        num_blocks = -(-R // tile_r)
        if num_blocks % 2 == 1:
            # Prefer an even block count so the parallel axis splits evenly
            # across the two TensorCores on v7x (best-effort heuristic).
            num_blocks += 1
            tile_r = max(8, ((-(-R // num_blocks)) + 7) // 8 * 8)
            num_blocks = -(-R // tile_r)

    out = pl.pallas_call(
        _fixed_mean_kernel,
        out_shape=jax.ShapeDtypeStruct((R, W), mean.dtype),
        grid=(num_blocks,),
        in_specs=[pl.BlockSpec((1, W), lambda i: (0, 0))],      # grid-invariant
        out_specs=pl.BlockSpec((tile_r, W), lambda i: (i, 0)),
        compiler_params=pltpu.CompilerParams(
            dimension_semantics=("parallel",),                  # independent tiles
            vmem_limit_bytes=32 * 1024 * 1024),
    )(mean_row)

    # Contiguous, layout-preserving reshape back to (N_pad, D); drop the padded
    # rows (they are just extra copies of the mean) when padding was needed.
    out = out.reshape(N_pad, D)
    if N_pad != N:
        out = out[:N]
    return out


if __name__ == "__main__":
    key = jax.random.PRNGKey(0)
    k_x, k_m, k_m2 = jax.random.split(key, 3)

    # Case 1: nominal small shapes (N divisible by the row-fold factor).
    N, B, D = 8, 32, 16
    x = jax.random.normal(k_x, (N, B), jnp.float32)
    mean = jax.random.normal(k_m, (D,), jnp.float32)
    y = fixed_mean_forward(x, mean)
    jax.block_until_ready(y)
    assert y.shape == (N, D)
    assert jnp.array_equal(y, jnp.broadcast_to(mean.reshape(1, D), (N, D)))

    # Case 2: awkward N and D (exercises the pad-then-slice lane-dense path;
    # previously this fell back to masked partial stores).
    N2, D2 = 13, 5
    x2 = jax.random.normal(k_x, (N2, 7), jnp.float32)
    mean2 = jax.random.normal(k_m2, (D2,), jnp.float32)
    y2 = fixed_mean_forward(x2, mean2)
    jax.block_until_ready(y2)
    assert y2.shape == (N2, D2)
    assert jnp.array_equal(y2, jnp.broadcast_to(mean2.reshape(1, D2), (N2, D2)))

    # Case 3: 1-D input returns the mean vector itself.
    y1 = fixed_mean_forward(x[0], mean)
    jax.block_until_ready(y1)
    assert y1.shape == (D,)
    assert jnp.array_equal(y1, mean)

    print("KERNEL_OK")
</pallas_src>

<mosaic_0001>
module attributes {stable_mosaic.version = 11 : i64} {
  func.func @_fixed_mean_kernel(%arg0: i32, %arg1: memref<1x128xf32, #tpu.memory_space<vmem>>, %arg2: memref<1x128xf32, #tpu.memory_space<vmem>>) attributes {dimension_semantics = [#tpu.dimension_semantics<parallel>], iteration_bounds = array<i64: 1>, scalar_prefetch = 0 : i64, scratch_operands = 0 : i64, tpu.core_type = #tpu.core_type<tc>, window_params = [{pipeline_mode = #tpu.pipeline_mode<synchronous>, transform_indices = @transform_0, window_bounds = array<i64: 1, 128>}, {transform_indices = @transform_1, window_bounds = array<i64: 1, 128>}]} {
    %c0 = arith.constant 0 : index
    %c0_0 = arith.constant 0 : index
    %0 = vector.load %arg1[%c0, %c0_0] : memref<1x128xf32, #tpu.memory_space<vmem>>, vector<1x128xf32>
    %c0_1 = arith.constant 0 : index
    %c0_2 = arith.constant 0 : index
    %1 = vector.load %arg2[%c0_1, %c0_2] : memref<1x128xf32, #tpu.memory_space<vmem>>, vector<1x128xf32>
    tpu.vector_store %arg2[%c0_1, %c0_2], %0 {strides = array<i32>} : memref<1x128xf32, #tpu.memory_space<vmem>>, vector<1x128xf32>,
    return
  }
  func.func @transform_0(%arg0: i32) -> (i32, i32) {
    %c0_i32 = arith.constant 0 : i32
    %c0_i32_0 = arith.constant 0 : i32
    %c0_i32_1 = arith.constant 0 : i32
    return %c0_i32, %c0_i32_0 : i32, i32
  }
  func.func @transform_1(%arg0: i32) -> (i32, i32) {
    %c0_i32 = arith.constant 0 : i32
    %c0_i32_0 = arith.constant 0 : i32
    return %arg0, %c0_i32 : i32, i32
  }
}

</mosaic_0001>

<bundles_post_ra>
// kernel: tpu_custom_call.1
= control target key start
LH: loop header
LB: loop body
LE: loop exit
PB: predicated region body
PF: predicated region fallthrough
CT: control target
= control target key end

     0   :  { %6 = vsyncpa [#allocation3], 0  ;;  %s114_s0 = inlined_call_operand.hbm [shape: f32[1,128], index: 0, kind: input, shape index: {}]   ;;  %s115_s1 = inlined_call_operand.hbm [shape: f32[1,128], index: 1, kind: output, shape index: {}]  }
   0x1   :  { %7 = vsyncpa [#allocation4], 0  ;;  %s13_s8 = sshll.u32 %s114_s0, 4  ;;  %s96_s9 = smov [#allocation2]   ;;  %s14_s8 = int_to_ptr.hbm [resolvable:$true] %s13_s8 }
   0x2   :  { %s15_s10 = sshll.u32 %s96_s9, 4  ;;  %s16_s10 = int_to_ptr.vmem [resolvable:$true] %s15_s10 }
   0x3   :  { %18 = dma.hbm_to_vmem [thread:$0]  %s14_s8, 16, %s16_s10, [#allocation3]  }
   0x4   :  { %92 = dma.done.wait [#allocation3], 16  }
   0x5   :  { %93 = vsyncadd [#allocation3], 4294967280  ;;  %s97_s11 = smov [#allocation5]   ;;  %s32_s15 = sshll.u32 %s115_s1, 4  ;;  %v23_v0 = vld [vmem:[#allocation2] sm:$0x1]  ;;  %s33_s15 = int_to_ptr.hbm [resolvable:$true] %s32_s15 }
   0x6   :  { %s30_s12 = sshll.u32 %s97_s11, 4  ;;  %24 = vst [vmem:[#allocation5] sm:$0x1] %v23_v0  ;;  %s31_s12 = int_to_ptr.vmem [resolvable:$true] %s30_s12 }
   0x7   :  { %35 = dma.vmem_to_hbm [thread:$0]  %s31_s12, 16, %s33_s15, [#allocation4]  }
   0x8   :  { %94 = dma.done.wait [#allocation4], 16  }
   0x9   :  { %95 = vsyncadd [#allocation4], 4294967280 }
   0xa   :  { %40 = vsyncpa [#allocation3], 1 }
   0xb   :  { %41 = vsyncpa [#allocation4], 1 }

</bundles_post_ra>
